<compile_context>
chip_gen: v5e
topology: v5e:2x2
jax: 0.10.0
libtpu: 0.0.40
codegen_flags: <defaults>
</compile_context>

<pallas_src>
import functools
from copy import deepcopy

import jax
import jax.numpy as jnp
from jax.experimental import pallas as pl
from jax.experimental.pallas import tpu as pltpu


# MXU-native operand dtype for weights / in-kernel casts.  f32 accumulation is
# always used.  Set to jnp.float32 for bit-exact nn.Linear numerics.
_COMPUTE_DTYPE = jnp.bfloat16


# ------------------------------ VMEM budget -------------------------------- #
@functools.lru_cache(maxsize=None)
def _vmem_limit_bytes():
    """Per-generation scoped-VMEM request with ~25% headroom for compiler
    scratch (≈48 MiB on v7x/64 MiB chips, ≈96 MiB on v5e/v6e/128 MiB chips)."""
    cap = 64 * 1024 * 1024  # conservative default == v7x physical VMEM
    try:
        info = pltpu.get_tpu_info()
        cap = int(getattr(info, "vmem_capacity_bytes", cap))
    except Exception:
        pass
    return (cap * 3) // 4


# ------------------------------ tile helpers ------------------------------- #
def _tile_free(dim, target, align):
    """Tile for a non-reduction (M/N) dim: full extent when small, otherwise an
    aligned tile <= target.  Exact divisors are preferred; if none exists the
    target-sized tile is kept and the ragged last block is masked by Pallas
    (out-of-bounds rows/cols only ever feed masked output regions)."""
    if dim <= target:
        return dim
    t = target - (target % align)
    s = t
    while s >= align:
        if dim % s == 0:
            return s
        s -= align
    return t


def _tile_red(dim, target, align):
    """Tile for the K (reduction) dim: must divide exactly so no out-of-bounds
    garbage is summed into the accumulator; falls back to the full extent."""
    if dim <= target:
        return dim
    t = target - (target % align)
    while t >= align:
        if dim % t == 0:
            return t
        t -= align
    return dim


def _split_for_two_cores(tm, m, n_parallel_tiles):
    """If the parallel grid has a single tile and M allows it, halve tm so the
    second v7x TensorCore gets work (harmless one extra step on v5e/v6e)."""
    if n_parallel_tiles == 1 and m >= 16:
        return max(8, -(-(tm // 2) // 8) * 8)
    return tm


# ----------------------- tiled Linear Pallas kernel ------------------------ #
def _linear_tiled_kernel(x_ref, wt_ref, b_ref, o_ref, acc_ref):
    # grid = (M tiles, N tiles, K tiles); K (reduction) is last / "arbitrary".
    k = pl.program_id(2)

    @pl.when(k == 0)
    def _():
        acc_ref[...] = jnp.zeros_like(acc_ref)

    w = wt_ref[...]                      # bf16 (or f32) weight tile
    acc_ref[...] += jnp.dot(x_ref[...].astype(w.dtype), w,
                            preferred_element_type=jnp.float32)

    @pl.when(k == pl.num_programs(2) - 1)
    def _():
        # Bias added exactly once, in f32, in the finalize step.
        o_ref[...] = (acc_ref[...] + b_ref[...]).astype(o_ref.dtype)


def linear_pallas(x2d, wt, b2):
    """torch.nn.Linear semantics: y = x @ W.T + b, with wt = W.T (in, out) in
    the compute dtype and b2 = bias[None, :] (f32), prepared once at init."""
    M, K = x2d.shape
    K2, N = wt.shape
    assert K == K2
    # MXU-aligned, roofline-sized targets (256/512/1024); K tile kept long to
    # amortize per-grid-step overhead on the 256x256 MXUs of v6e/v7x.
    tm = _tile_free(M, 256, 8)
    tn = _tile_free(N, 512, 128)
    tk = _tile_red(K, 1024, 128)
    tm = _split_for_two_cores(tm, M, pl.cdiv(M, tm) * pl.cdiv(N, tn))
    grid = (pl.cdiv(M, tm), pl.cdiv(N, tn), pl.cdiv(K, tk))
    return pl.pallas_call(
        _linear_tiled_kernel,
        out_shape=jax.ShapeDtypeStruct((M, N), jnp.float32),
        grid=grid,
        in_specs=[
            pl.BlockSpec((tm, tk), lambda i, j, k: (i, k)),
            pl.BlockSpec((tk, tn), lambda i, j, k: (k, j)),
            pl.BlockSpec((1, tn), lambda i, j, k: (0, j)),
        ],
        out_specs=pl.BlockSpec((tm, tn), lambda i, j, k: (i, j)),
        scratch_shapes=[pltpu.VMEM((tm, tn), jnp.float32)],
        compiler_params=pltpu.CompilerParams(
            dimension_semantics=("parallel", "parallel", "arbitrary"),
            vmem_limit_bytes=_vmem_limit_bytes(),
        ),
    )(x2d, wt, b2)


# ---------------- fused branch-and-merge DAG Pallas kernel ----------------- #
def _make_fused_bm_kernel(n_branch, hb, ho):
    def kernel(x_ref, wt01_ref, b01_ref, wt2_ref, b2_ref, o_ref):
        wt01 = wt01_ref[...]
        cdt = wt01.dtype
        # One wide matmul computes every branch activation at once:
        #   y = x @ [W0.T | W1.T | ...] + [b0 | b1 | ...]     -> (tm, n*hb)
        y = jnp.dot(x_ref[...].astype(cdt), wt01,
                    preferred_element_type=jnp.float32) + b01_ref[...]
        # Cast to the compute dtype before the merge matmul: halves the live
        # vreg footprint of y and is the dtype wt2 wants anyway.
        y = y.astype(cdt)
        wt2 = wt2_ref[...]
        b2 = b2_ref[...]
        # Merge Linear per branch on in-register lane slices of y; the stacked
        # intermediate never touches HBM.  Output layout (tm, n*ho) is the
        # row-major flatten of the (tm, n, ho) torch.stack(dim=1) result.
        for j in range(n_branch):
            yj = y[:, j * hb:(j + 1) * hb]
            oj = jnp.dot(yj, wt2, preferred_element_type=jnp.float32) + b2
            o_ref[:, j * ho:(j + 1) * ho] = oj.astype(o_ref.dtype)
    return kernel


def fused_branch_merge_pallas(x2d, wt01, b01, wt2, b2, n_branch):
    M, K = x2d.shape
    K2, nhb = wt01.shape
    hb, ho = wt2.shape
    assert K == K2 and nhb == n_branch * hb
    # tm capped at 128: keeps the live (tm, n*hb) branch activation well below
    # the 64-vreg file so the merge matmul doesn't spill.
    tm = _tile_free(M, 128, 8)
    tm = _split_for_two_cores(tm, M, pl.cdiv(M, tm))
    kernel = _make_fused_bm_kernel(n_branch, hb, ho)
    return pl.pallas_call(
        kernel,
        out_shape=jax.ShapeDtypeStruct((M, n_branch * ho), jnp.float32),
        grid=(pl.cdiv(M, tm),),
        in_specs=[
            pl.BlockSpec((tm, K), lambda i: (i, 0)),
            pl.BlockSpec((K, nhb), lambda i: (0, 0)),   # weights resident in VMEM
            pl.BlockSpec((1, nhb), lambda i: (0, 0)),
            pl.BlockSpec((hb, ho), lambda i: (0, 0)),
            pl.BlockSpec((1, ho), lambda i: (0, 0)),
        ],
        out_specs=pl.BlockSpec((tm, n_branch * ho), lambda i: (i, 0)),
        compiler_params=pltpu.CompilerParams(
            dimension_semantics=("parallel",),   # batch tiles split across TCs
            vmem_limit_bytes=_vmem_limit_bytes(),
        ),
    )(x2d, wt01, b01, wt2, b2)


# --------------------- fused chain DAG Pallas kernel ----------------------- #
def _make_chain_kernel(n_layers):
    def kernel(*refs):
        # refs = (x_ref, wt0, b0, wt1, b1, ..., o_ref)
        x_ref = refs[0]
        o_ref = refs[-1]
        h = x_ref[...]
        for l in range(n_layers):
            w = refs[1 + 2 * l][...]
            b = refs[2 + 2 * l][...]
            h = jnp.dot(h.astype(w.dtype), w,
                        preferred_element_type=jnp.float32) + b
        o_ref[...] = h.astype(o_ref.dtype)
    return kernel


def fused_chain_pallas(x2d, wts, bs):
    """Linear -> Linear -> ... chain in one pallas_call; intermediates never
    round-trip HBM and only one launch is paid for the whole chain."""
    M, K = x2d.shape
    n_layers = len(wts)
    N_out = wts[-1].shape[1]
    tm = _tile_free(M, 128, 8)
    tm = _split_for_two_cores(tm, M, pl.cdiv(M, tm))
    in_specs = [pl.BlockSpec((tm, K), lambda i: (i, 0))]
    operands = [x2d]
    for wt, b in zip(wts, bs):
        in_specs.append(pl.BlockSpec(wt.shape, lambda i: (0, 0)))
        in_specs.append(pl.BlockSpec(b.shape, lambda i: (0, 0)))
        operands.extend([wt, b])
    return pl.pallas_call(
        _make_chain_kernel(n_layers),
        out_shape=jax.ShapeDtypeStruct((M, N_out), jnp.float32),
        grid=(pl.cdiv(M, tm),),
        in_specs=in_specs,
        out_specs=pl.BlockSpec((tm, N_out), lambda i: (i, 0)),
        compiler_params=pltpu.CompilerParams(
            dimension_semantics=("parallel",),
            vmem_limit_bytes=_vmem_limit_bytes(),
        ),
    )(*operands)


# ----------------------------- module wrappers ----------------------------- #
class LinearModule:
    """JAX mirror of torch.nn.Linear(in_features, out_features)."""

    def __init__(self, key, in_features, out_features, compute_dtype=_COMPUTE_DTYPE):
        self.in_features = in_features
        self.out_features = out_features
        kw, kb = jax.random.split(key)
        bound = 1.0 / (in_features ** 0.5)
        self.weight = jax.random.uniform(
            kw, (out_features, in_features), jnp.float32, -bound, bound)
        self.bias = jax.random.uniform(
            kb, (out_features,), jnp.float32, -bound, bound)
        # Hoisted once at init: W.T in the MXU-native dtype (bf16 halves weight
        # HBM/VMEM bytes and gives ~2-4x MXU throughput), bias kept f32 and
        # added to the f32 accumulator inside the kernels.
        self.wt = jnp.asarray(self.weight.T, dtype=compute_dtype)   # (in, out)
        self.b2 = self.bias.reshape(1, out_features).astype(jnp.float32)

    def __call__(self, x):
        # nn.Linear applies to the last dim; flatten leading dims (glue).
        lead = x.shape[:-1]
        y = linear_pallas(x.reshape((-1, x.shape[-1])), self.wt, self.b2)
        return y.reshape(lead + (self.out_features,))


# ------------------------ DAG executor (Submodule) -------------------------- #
class SubmoduleJax:
    """Faithful mirror of Submodule.forward / moduleForward."""

    def __init__(self, moduleList, dependency, output, fitlist):
        self.moduleList = moduleList
        self.dependency = dependency
        self.fitlist = fitlist
        self.size = len(moduleList)

    def moduleForward(self, idx, cache):
        if idx == -1:
            return cache[-1]
        modulein = []
        for i in self.dependency[idx]:
            if not self.fitlist[i] and i != -1:
                ct = i
                while not self.fitlist[ct]:
                    assert len(self.dependency[ct]) == 1, \
                        'skip fit should depend on only one input'
                    ct = self.dependency[ct][0]
                    if ct == -1:
                        break
                cidx = ct
            else:
                cidx = i
            if cache[cidx] is not None:
                modulein.append(cache[cidx])
            else:
                modulein.append(self.moduleForward(cidx, cache))
        if len(modulein) == 1:
            modulein = modulein[0]
        else:
            modulein = jnp.stack(modulein, axis=1)   # torch.stack(dim=1)
        result = self.moduleList[idx](modulein)
        cache[idx] = result
        return result

    def forward(self, x, output):
        outlist, outidxlist = [], []
        cache = [None] * (len(self.moduleList) + 1)
        cache[-1] = x
        for i in output:
            ct = i
            processed = False
            if ct == -1:
                outidxlist.append(ct)
            else:
                while not self.fitlist[ct]:
                    if len(self.dependency[ct]) == 1:
                        ct = self.dependency[ct][0]
                    else:
                        for k in self.dependency[ct]:
                            assert self.fitlist[k], \
                                'does not support multiple dependency with fit module to be False'
                            outidxlist.append(k)
                            processed = True
                        break
                if not processed:
                    outidxlist.append(ct)
        for ct in outidxlist:
            outlist.append(self.moduleForward(ct, cache))
        if len(outlist) == 1:
            return outlist[0]
        return outlist

    __call__ = forward


class DAGModuleJax:
    """Forward-path mirror of DAGModule (no DefenseModule => all fit flags True)."""
    # TODO(synk): DefenseModule / BPDAWrapper branches and the fit/advfit training
    # utilities are not instantiated in this synthetic DAG; the skip-fit traversal
    # logic above is kept verbatim anyway.

    def __init__(self, moduleList, dependency=None, output=None, allow_fusion=True):
        self.moduleList = moduleList
        self.dependency = []
        self.train_fit = [True] * len(moduleList)
        self.test_fit = [True] * len(moduleList)
        self.training = True
        if dependency is None:
            ct = -1
            for _ in moduleList:
                self.dependency.append([ct])
                ct += 1
        else:
            self.dependency = dependency
        self.output = [len(moduleList) - 1] if output is None else output
        self.depend_copy = deepcopy(self.dependency)
        self.output_copy = deepcopy(self.output)
        assert len(self.moduleList) == len(self.dependency)
        assert len(self.output)
        self.train_model = SubmoduleJax(moduleList, self.dependency, self.output, self.train_fit)
        self.eval_model = SubmoduleJax(moduleList, self.dependency, self.output, self.test_fit)
        self.bpda_model = None
        self._fused_plan = self._build_fused_plan() if allow_fusion else None

    def _build_fused_plan(self):
        """Detect fusable DAG patterns and precompute kernel operands.
        Pattern A: k parallel Linears on x -> stack(dim=1) -> merge Linear.
        Pattern B: a pure Linear chain.  Each plan is only kept if its resident
        operands fit a per-generation VMEM budget; otherwise the generic tiled
        per-node path is used."""
        mods = self.moduleList
        n = len(mods)
        if n < 2 or self.output != [n - 1]:
            return None
        if not all(isinstance(m, LinearModule) for m in mods):
            return None
        limit = _vmem_limit_bytes() // 2   # keep the fused call at <= half VMEM

        # --- Pattern A: branch-and-merge ---
        branch_ids = self.dependency[n - 1]
        if (n >= 3 and len(branch_ids) >= 2
                and sorted(branch_ids) == list(range(n - 1))
                and all(self.dependency[b] == [-1] for b in branch_ids)):
            merge = mods[n - 1]
            branches = [mods[b] for b in branch_ids]
            hb = branches[0].out_features
            kin = branches[0].in_features
            if (all(m.out_features == hb and m.in_features == kin for m in branches)
                    and merge.in_features == hb):
                nb = len(branches)
                ho = merge.out_features
                wsz = jnp.dtype(branches[0].wt.dtype).itemsize
                tm = 128
                est = 2 * (tm * kin * 4                       # x tile (dbl-buffered)
                           + kin * nb * hb * wsz + nb * hb * 4    # wt01 + b01
                           + hb * ho * wsz + ho * 4               # wt2 + b2
                           + tm * nb * ho * 4)                    # output tile
                est += tm * nb * hb * 4                        # live branch activation
                if est <= limit:
                    wt01 = jnp.concatenate([m.wt for m in branches], axis=1)
                    b01 = jnp.concatenate([m.b2 for m in branches], axis=1)
                    return {"kind": "branch_merge", "wt01": wt01, "b01": b01,
                            "wt2": merge.wt, "b2": merge.b2, "n": nb, "ho": ho}
            return None

        # --- Pattern B: pure chain ---
        is_chain = (self.dependency[0] == [-1]
                    and all(self.dependency[i] == [i - 1] for i in range(1, n)))
        if is_chain and all(mods[i].in_features == mods[i - 1].out_features
                            for i in range(1, n)):
            wsz = jnp.dtype(mods[0].wt.dtype).itemsize
            tm = 128
            widths = [mods[0].in_features] + [m.out_features for m in mods]
            est = 2 * tm * widths[0] * 4 + 2 * tm * widths[-1] * 4
            est += 2 * sum(m.in_features * m.out_features * wsz + m.out_features * 4
                           for m in mods)
            est += tm * max(widths) * 4                       # live intermediate
            if est <= limit:
                return {"kind": "chain",
                        "wts": [m.wt for m in mods],
                        "bs": [m.b2 for m in mods],
                        "no": mods[-1].out_features}
        return None

    def train(self, mode=True):
        self.training = mode
        return self

    def eval(self):
        return self.train(False)

    def forward(self, x):
        if self._fused_plan is not None:
            # All fit flags are True here, so train/eval paths are identical
            # and the single fused pallas_call is valid for both.
            p = self._fused_plan
            lead = x.shape[:-1]
            flat_x = x.reshape((-1, x.shape[-1]))
            if p["kind"] == "branch_merge":
                flat = fused_branch_merge_pallas(
                    flat_x, p["wt01"], p["b01"], p["wt2"], p["b2"], p["n"])
                return flat.reshape(lead + (p["n"], p["ho"]))
            flat = fused_chain_pallas(flat_x, p["wts"], p["bs"])
            return flat.reshape(lead + (p["no"],))
        if self.training:
            return self.train_model(x, self.output)
        return self.eval_model(x, self.output)

    __call__ = forward


# ---------------------------------- main ------------------------------------ #
if __name__ == "__main__":
    B, H = 2, 128   # lane-dense feature width (>= 128)
    key = jax.random.PRNGKey(0)
    k_x, k0, k1, k2 = jax.random.split(key, 4)

    x = jax.random.normal(k_x, (B, H), jnp.float32)

    # Branch-and-merge DAG:
    #   node0: Linear(H,H)(x)                              deps [-1]
    #   node1: Linear(H,H)(x)                              deps [-1]
    #   node2: Linear(H,H)(stack([out0, out1], dim=1))     deps [0, 1]
    m0 = LinearModule(k0, H, H)
    m1 = LinearModule(k1, H, H)
    m2 = LinearModule(k2, H, H)

    # Fused path: the whole 3-node branch-and-merge DAG is one pallas_call.
    dag_fused = DAGModuleJax([m0, m1, m2], dependency=[[-1], [-1], [0, 1]], output=[2])
    out_fused = jax.block_until_ready(dag_fused(x))

    # Same DAG with fusion disabled: generic per-node tiled-kernel path.
    dag_generic = DAGModuleJax([m0, m1, m2], dependency=[[-1], [-1], [0, 1]],
                               output=[2], allow_fusion=False)
    out_generic = jax.block_until_ready(dag_generic(x))

    # Chain DAG (default dependency [[-1],[0],[1]]): fused-chain kernel...
    dag_chain = DAGModuleJax([m0, m1, m2])
    out_chain = jax.block_until_ready(dag_chain(x))
    # ...and the same chain via the generic per-node path.
    dag_chain_gen = DAGModuleJax([m0, m1, m2], allow_fusion=False)
    out_chain_gen = jax.block_until_ready(dag_chain_gen(x))

    # Pure-JAX full-precision references.  Kernels feed the MXU bf16 (with f32
    # accumulation), so tolerances are loosened to ~5e-2 per the review.
    def ref_linear(v, m):
        return jnp.matmul(v, m.weight.T, precision=jax.lax.Precision.HIGHEST) + m.bias

    r0 = ref_linear(x, m0)
    r1 = ref_linear(x, m1)
    ref_bm = ref_linear(jnp.stack([r0, r1], axis=1), m2)
    ref_chain = ref_linear(ref_linear(ref_linear(x, m0), m1), m2)

    TOL = dict(atol=5e-2, rtol=5e-2)
    assert out_fused.shape == (B, 2, H), out_fused.shape
    assert jnp.allclose(out_fused, ref_bm, **TOL), \
        float(jnp.abs(out_fused - ref_bm).max())
    assert jnp.allclose(out_generic, ref_bm, **TOL), \
        float(jnp.abs(out_generic - ref_bm).max())
    assert jnp.allclose(out_fused, out_generic, **TOL), \
        float(jnp.abs(out_fused - out_generic).max())
    assert out_chain.shape == (B, H), out_chain.shape
    assert jnp.allclose(out_chain, ref_chain, **TOL), \
        float(jnp.abs(out_chain - ref_chain).max())
    assert jnp.allclose(out_chain_gen, ref_chain, **TOL), \
        float(jnp.abs(out_chain_gen - ref_chain).max())
    assert jnp.allclose(out_chain, out_chain_gen, **TOL), \
        float(jnp.abs(out_chain - out_chain_gen).max())

    print("KERNEL_OK")
</pallas_src>

<mosaic_0001>
module attributes {stable_mosaic.version = 11 : i64} {
  func.func @kernel(%arg0: i32, %arg1: memref<2x128xf32, #tpu.memory_space<vmem>>, %arg2: memref<128x256xbf16, #tpu.memory_space<vmem>>, %arg3: memref<1x256xf32, #tpu.memory_space<vmem>>, %arg4: memref<128x128xbf16, #tpu.memory_space<vmem>>, %arg5: memref<1x128xf32, #tpu.memory_space<vmem>>, %arg6: memref<2x256xf32, #tpu.memory_space<vmem>>) attributes {dimension_semantics = [#tpu.dimension_semantics<parallel>], iteration_bounds = array<i64: 1>, scalar_prefetch = 0 : i64, scratch_operands = 0 : i64, tpu.core_type = #tpu.core_type<tc>, window_params = [{transform_indices = @transform_0, window_bounds = array<i64: 2, 128>}, {pipeline_mode = #tpu.pipeline_mode<synchronous>, transform_indices = @transform_1, window_bounds = array<i64: 128, 256>}, {pipeline_mode = #tpu.pipeline_mode<synchronous>, transform_indices = @transform_2, window_bounds = array<i64: 1, 256>}, {pipeline_mode = #tpu.pipeline_mode<synchronous>, transform_indices = @transform_3, window_bounds = array<i64: 128, 128>}, {pipeline_mode = #tpu.pipeline_mode<synchronous>, transform_indices = @transform_4, window_bounds = array<i64: 1, 128>}, {transform_indices = @transform_5, window_bounds = array<i64: 2, 256>}]} {
    %c0 = arith.constant 0 : index
    %c0_0 = arith.constant 0 : index
    %0 = vector.load %arg2[%c0, %c0_0] : memref<128x256xbf16, #tpu.memory_space<vmem>>, vector<128x256xbf16>
    %c0_1 = arith.constant 0 : index
    %c0_2 = arith.constant 0 : index
    %1 = vector.load %arg1[%c0_1, %c0_2] : memref<2x128xf32, #tpu.memory_space<vmem>>, vector<2x128xf32>
    %2 = arith.truncf %1 : vector<2x128xf32> to vector<2x128xbf16>
    %cst = arith.constant dense<0.000000e+00> : vector<2x256xf32>
    %3 = tpu.matmul %2, %0, %cst {dimension_numbers = #tpu.dot_dimension_numbers<[1], [0], [0], [1], [0, 0, 1, 1], [], []>} : vector<2x128xbf16>, vector<128x256xbf16>, vector<2x256xf32> -> vector<2x256xf32>
    %c0_3 = arith.constant 0 : index
    %c0_4 = arith.constant 0 : index
    %4 = vector.load %arg3[%c0_3, %c0_4] : memref<1x256xf32, #tpu.memory_space<vmem>>, vector<1x256xf32>
    %5 = vector.broadcast %4 : vector<1x256xf32> to vector<2x256xf32>
    %6 = arith.addf %3, %5 : vector<2x256xf32>
    %7 = arith.truncf %6 : vector<2x256xf32> to vector<2x256xbf16>
    %c0_5 = arith.constant 0 : index
    %c0_6 = arith.constant 0 : index
    %8 = vector.load %arg4[%c0_5, %c0_6] : memref<128x128xbf16, #tpu.memory_space<vmem>>, vector<128x128xbf16>
    %c0_7 = arith.constant 0 : index
    %c0_8 = arith.constant 0 : index
    %9 = vector.load %arg5[%c0_7, %c0_8] : memref<1x128xf32, #tpu.memory_space<vmem>>, vector<1x128xf32>
    %10 = vector.extract_strided_slice %7 {offsets = [0, 0], sizes = [2, 128], strides = [1, 1]} : vector<2x256xbf16> to vector<2x128xbf16>
    %cst_9 = arith.constant dense<0.000000e+00> : vector<2x128xf32>
    %11 = tpu.matmul %10, %8, %cst_9 {dimension_numbers = #tpu.dot_dimension_numbers<[1], [0], [0], [1], [0, 0, 1, 1], [], []>} : vector<2x128xbf16>, vector<128x128xbf16>, vector<2x128xf32> -> vector<2x128xf32>
    %12 = vector.broadcast %9 : vector<1x128xf32> to vector<2x128xf32>
    %13 = arith.addf %11, %12 : vector<2x128xf32>
    %c0_10 = arith.constant 0 : index
    %c0_11 = arith.constant 0 : index
    %14 = vector.load %arg6[%c0_10, %c0_11] : memref<2x256xf32, #tpu.memory_space<vmem>>, vector<2x128xf32>
    tpu.vector_store %arg6[%c0_10, %c0_11], %13 {strides = array<i32>} : memref<2x256xf32, #tpu.memory_space<vmem>>, vector<2x128xf32>,
    %15 = vector.extract_strided_slice %7 {offsets = [0, 128], sizes = [2, 128], strides = [1, 1]} : vector<2x256xbf16> to vector<2x128xbf16>
    %cst_12 = arith.constant dense<0.000000e+00> : vector<2x128xf32>
    %16 = tpu.matmul %15, %8, %cst_12 {dimension_numbers = #tpu.dot_dimension_numbers<[1], [0], [0], [1], [0, 0, 1, 1], [], []>} : vector<2x128xbf16>, vector<128x128xbf16>, vector<2x128xf32> -> vector<2x128xf32>
    %17 = vector.broadcast %9 : vector<1x128xf32> to vector<2x128xf32>
    %18 = arith.addf %16, %17 : vector<2x128xf32>
    %c0_13 = arith.constant 0 : index
    %c128 = arith.constant 128 : index
    %19 = vector.load %arg6[%c0_13, %c128] : memref<2x256xf32, #tpu.memory_space<vmem>>, vector<2x128xf32>
    tpu.vector_store %arg6[%c0_13, %c128], %18 {strides = array<i32>} : memref<2x256xf32, #tpu.memory_space<vmem>>, vector<2x128xf32>,
    return
  }
  func.func @transform_0(%arg0: i32) -> (i32, i32) {
    %c0_i32 = arith.constant 0 : i32
    %c0_i32_0 = arith.constant 0 : i32
    return %arg0, %c0_i32 : i32, i32
  }
  func.func @transform_1(%arg0: i32) -> (i32, i32) {
    %c0_i32 = arith.constant 0 : i32
    %c0_i32_0 = arith.constant 0 : i32
    %c0_i32_1 = arith.constant 0 : i32
    return %c0_i32, %c0_i32_0 : i32, i32
  }
  func.func @transform_2(%arg0: i32) -> (i32, i32) {
    %c0_i32 = arith.constant 0 : i32
    %c0_i32_0 = arith.constant 0 : i32
    %c0_i32_1 = arith.constant 0 : i32
    return %c0_i32, %c0_i32_0 : i32, i32
  }
  func.func @transform_3(%arg0: i32) -> (i32, i32) {
    %c0_i32 = arith.constant 0 : i32
    %c0_i32_0 = arith.constant 0 : i32
    %c0_i32_1 = arith.constant 0 : i32
    return %c0_i32, %c0_i32_0 : i32, i32
  }
  func.func @transform_4(%arg0: i32) -> (i32, i32) {
    %c0_i32 = arith.constant 0 : i32
    %c0_i32_0 = arith.constant 0 : i32
    %c0_i32_1 = arith.constant 0 : i32
    return %c0_i32, %c0_i32_0 : i32, i32
  }
  func.func @transform_5(%arg0: i32) -> (i32, i32) {
    %c0_i32 = arith.constant 0 : i32
    %c0_i32_0 = arith.constant 0 : i32
    return %arg0, %c0_i32 : i32, i32
  }
}

</mosaic_0001>

<bundles_post_ra>
// kernel: tpu_custom_call.1
= control target key start
LH: loop header
LB: loop body
LE: loop exit
PB: predicated region body
PF: predicated region fallthrough
CT: control target
= control target key end

     0   :  { %10 = vsyncpa [#allocation3], 0  ;;  %s645_s0 = inlined_call_operand.hbm [shape: f32[2,128], index: 0, kind: input, shape index: {}]   ;;  %s646_s1 = inlined_call_operand.hbm [shape: bf16[128,256], index: 1, kind: input, shape index: {}]   ;;  %s647_s2 = inlined_call_operand.hbm [shape: f32[1,256], index: 2, kind: input, shape index: {}]   ;;  %s648_s3 = inlined_call_operand.hbm [shape: bf16[128,128], index: 3, kind: input, shape index: {}]   ;;  %s649_s4 = inlined_call_operand.vmem [shape: f32[1,128], index: 4, kind: input, shape index: {}]   ;;  %s650_s5 = inlined_call_operand.hbm [shape: f32[2,256], index: 5, kind: output, shape index: {}]  }
   0x1   :  { %11 = vsyncpa [#allocation6], 0 }
   0x2   :  { %12 = vsyncpa [#allocation9], 0  ;;  %s29_s20 = sshll.u32 %s646_s1, 4  ;;  %s30_s20 = int_to_ptr.hbm [resolvable:$true] %s29_s20 }
   0x3   :  { %13 = vsyncpa [#allocation4], 0  ;;  %s588_s21 = smov [#allocation5]   ;;  %s19_s25 = sshll.u32 %s645_s0, 4  ;;  %s20_s25 = int_to_ptr.hbm [resolvable:$true] %s19_s25 }
   0x4   :  { %s31_s22 = sshll.u32 %s588_s21, 4  ;;  %s589_s26 = smov 128   ;;  %s32_s22 = int_to_ptr.vmem [resolvable:$true] %s31_s22 }
   0x5   :  { %s590_s27 = smov 8   ;;  %s591_s28 = smov [#allocation2]  }
   0x6   :  { %37 = dma.hbm_to_vmem [thread:$0]  %s30_s20, 2048, %s32_s22, [#allocation6], %s589_s26, %s589_s26, %s590_s27  }
   0x7   :  { %s21_s29 = sshll.u32 %s591_s28, 4  ;;  %s43_s7 = sshll.u32 %s647_s2, 4  ;;  %s22_s29 = int_to_ptr.vmem [resolvable:$true] %s21_s29  ;;  %s44_s7 = int_to_ptr.hbm [resolvable:$true] %s43_s7 }
   0x8   :  { %24 = dma.hbm_to_vmem [thread:$0]  %s20_s25, 32, %s22_s29, [#allocation3]  }
   0x9   :  { %s53_s9 = sshll.u32 %s648_s3, 4  ;;  %s592_s10 = smov [#allocation7]   ;;  %s54_s9 = int_to_ptr.hbm [resolvable:$true] %s53_s9 }
   0xa   :  { %s45_s11 = sshll.u32 %s592_s10, 4  ;;  %s593_s0 = smov [#allocation8]   ;;  %s46_s11 = int_to_ptr.vmem [resolvable:$true] %s45_s11 }
   0xb   :  { %48 = dma.hbm_to_vmem [thread:$0]  %s44_s7, 32, %s46_s11, [#allocation6]  }
   0xc   :  { %s55_s12 = sshll.u32 %s593_s0, 4  ;;  %s594_s13 = smov 64   ;;  %s56_s12 = int_to_ptr.vmem [resolvable:$true] %s55_s12 }
   0xd   :  { %s595_s14 = smov 4  }
   0xe   :  { %61 = dma.hbm_to_vmem [thread:$0]  %s54_s9, 1024, %s56_s12, [#allocation9], %s594_s13, %s594_s13, %s595_s14  }
   0xf   :  { %580 = dma.done.wait [#allocation3], 32  }
  0x10   :  { %581 = vsyncadd [#allocation3], 4294967264 }
  0x11   :  { %582 = dma.done.wait [#allocation6], 2080  }
  0x12   :  { %583 = vsyncadd [#allocation6], 4294965216 }
  0x13   :  { %584 = dma.done.wait [#allocation9], 1024  }
  0x14   :  { %585 = vsyncadd [#allocation9], 4294966272  ;;  %v388_v0 = vld [vmem:[#allocation5 + $0x70] sm:$0xf]  ;;  %v441_v1 = vld [vmem:[#allocation5 + $0x74] sm:$0xf0] }
  0x15   :  { %v440_v2 = vld [vmem:[#allocation5 + $0x74] sm:$0xf]  ;;  %v389_v3 = vor.u32 %v441_v1, %v388_v0  ;;  %v390_v4 = vld [vmem:[#allocation5 + $0x78] sm:$0xf0]  ;;  %v380_v5 = vld [vmem:[#allocation5 + $0x60] sm:$0xf] }
  0x16   :  { %v439_v6 = vld [vmem:[#allocation5 + $0x64] sm:$0xf0]  ;;  %v393_v7 = vor.u32 %v440_v2, %v390_v4  ;;  %v438_v8 = vld [vmem:[#allocation5 + $0x64] sm:$0xf]  ;;  %v382_v9 = vld [vmem:[#allocation5 + $0x68] sm:$0xf0] }
  0x17   :  { %184 = vmatpush.bf16.msra.mxu0 %v389_v3  ;;  %v381_v10 = vor.u32 %v439_v6, %v380_v5  ;;  %v385_v11 = vor.u32 %v438_v8, %v382_v9  ;;  %v372_v12 = vld [vmem:[#allocation5 + $0x50] sm:$0xf]  ;;  %v437_v13 = vld [vmem:[#allocation5 + $0x54] sm:$0xf0]  ;;  %v436_v14 = vld [vmem:[#allocation5 + $0x54] sm:$0xf] }
  0x18   :  { %197 = vmatpush.bf16.msra.mxu1 %v393_v7  ;;  %v374_v15 = vld [vmem:[#allocation5 + $0x58] sm:$0xf0]  ;;  %v373_v16 = vor.u32 %v437_v13, %v372_v12  ;;  %v364_v18 = vld [vmem:[#allocation5 + $0x40] sm:$0xf]  ;;  %v435_v19 = vld [vmem:[#allocation5 + $0x44] sm:$0xf0] }
  0x19   :  { %v377_v17 = vor.u32 %v436_v14, %v374_v15  ;;  %v434_v20 = vld [vmem:[#allocation5 + $0x44] sm:$0xf]  ;;  %v366_v21 = vld [vmem:[#allocation5 + $0x48] sm:$0xf0]  ;;  %v365_v22 = vor.u32 %v435_v19, %v364_v18  ;;  %v449_v23 = vld [vmem:[#allocation8 + $0x38] sm:$0xff]  ;;  %s596_s15 = smov [#allocation10]  }
  0x1a   :  { %v369_v24 = vor.u32 %v434_v20, %v366_v21  ;;  %v356_v25 = vld [vmem:[#allocation5 + $0x30] sm:$0xf]  ;;  %v433_v26 = vld [vmem:[#allocation5 + $0x34] sm:$0xf0]  ;;  %v432_v27 = vld [vmem:[#allocation5 + $0x34] sm:$0xf]  ;;  %279 = vmatpush.bf16.msra.mxu2 %v449_v23  ;;  %297 = vmatpush.bf16.msra.mxu3 %v449_v23 }
  0x1b   :  { %185 = vmatpush.bf16.msra.mxu0 %v381_v10  ;;  %v358_v28 = vld [vmem:[#allocation5 + $0x38] sm:$0xf0]  ;;  %v448_v29 = vld [vmem:[#allocation8 + $0x30] sm:$0xff]  ;;  %v357_v30 = vor.u32 %v433_v26, %v356_v25  ;;  %v348_v32 = vld [vmem:[#allocation5 + $0x20] sm:$0xf]  ;;  %s316_s16 = sshll.u32 %s596_s15, 4  ;;  %s317_s16 = int_to_ptr.vmem [resolvable:$true] %s316_s16 }
  0x1c   :  { %198 = vmatpush.bf16.msra.mxu1 %v385_v11  ;;  %v361_v31 = vor.u32 %v432_v27, %v358_v28  ;;  %v431_v33 = vld [vmem:[#allocation5 + $0x24] sm:$0xf0]  ;;  %v430_v34 = vld [vmem:[#allocation5 + $0x24] sm:$0xf]  ;;  %v350_v35 = vld [vmem:[#allocation5 + $0x28] sm:$0xf0] }
  0x1d   :  { %v447_v36 = vld [vmem:[#allocation8 + $0x28] sm:$0xff]  ;;  %v349_v37 = vor.u32 %v431_v33, %v348_v32  ;;  %v353_v38 = vor.u32 %v430_v34, %v350_v35  ;;  %v429_v40 = vld [vmem:[#allocation5 + $0x14] sm:$0xf0]  ;;  %v428_v41 = vld [vmem:[#allocation5 + $0x14] sm:$0xf]  ;;  %s318_s19 = sshll.u32 %s650_s5, 4  ;;  %s319_s19 = int_to_ptr.hbm [resolvable:$true] %s318_s19 }
  0x1e   :  { %280 = vmatpush.bf16.msra.mxu2 %v448_v29  ;;  %298 = vmatpush.bf16.msra.mxu3 %v448_v29  ;;  %v340_v39 = vld [vmem:[#allocation5 + $0x10] sm:$0xf]  ;;  %v342_v42 = vld [vmem:[#allocation5 + $0x18] sm:$0xf0]  ;;  %v446_v43 = vld [vmem:[#allocation8 + $0x20] sm:$0xff] }
  0x1f   :  { %186 = vmatpush.bf16.msra.mxu0 %v373_v16  ;;  %v341_v44 = vor.u32 %v429_v40, %v340_v39  ;;  %v345_v45 = vor.u32 %v428_v41, %v342_v42  ;;  %v332_v46 = vld [vmem:[#allocation5] sm:$0xf]  ;;  %v427_v47 = vld [vmem:[#allocation5 + $0x4] sm:$0xf0]  ;;  %v426_v48 = vld [vmem:[#allocation5 + $0x4] sm:$0xf] }
  0x20   :  { %199 = vmatpush.bf16.msra.mxu1 %v377_v17  ;;  %v334_v49 = vld [vmem:[#allocation5 + $0x8] sm:$0xf0]  ;;  %v445_v50 = vld [vmem:[#allocation8 + $0x18] sm:$0xff]  ;;  %v333_v51 = vor.u32 %v427_v47, %v332_v46  ;;  %v444_v54 = vld [vmem:[#allocation8 + $0x10] sm:$0xff] }
  0x21   :  { %v96_v52 = vld [vmem:[#allocation2] sm:$0x3]  ;;  %v337_v53 = vor.u32 %v426_v48, %v334_v49  ;;  %v443_v56 = vld [vmem:[#allocation8 + $0x8] sm:$0xff]  ;;  %v442_v57 = vld [vmem:[#allocation8] sm:$0xff] }
  0x22   :  { %281 = vmatpush.bf16.msra.mxu2 %v447_v36  ;;  %299 = vmatpush.bf16.msra.mxu3 %v447_v36  ;;  %v97_v55 = vpack.c.bf16 %v96_v52, %v96_v52  ;;  %v98_v58 = vld [vmem:[#allocation7] sm:$0x3]  ;;  %v459_v6 = vld [vmem:[%s649_s4] ss:$0 sm:$0xff] }
  0x23   :  { %187 = vmatpush.bf16.msra.mxu0 %v365_v22  ;;  %v100_v59 = vperm.slane %v98_v58, 0  ;;  %v101_v60 = vperm.slane %v98_v58, 1 }
  0x24   :  { %200 = vmatpush.bf16.msra.mxu1 %v369_v24 }
  0x26   :  { %282 = vmatpush.bf16.msra.mxu2 %v446_v43  ;;  %300 = vmatpush.bf16.msra.mxu3 %v446_v43 }
  0x27   :  { %188 = vmatpush.bf16.msra.mxu0 %v357_v30 }
  0x28   :  { %201 = vmatpush.bf16.msra.mxu1 %v361_v31 }
  0x2a   :  { %283 = vmatpush.bf16.msra.mxu2 %v445_v50  ;;  %301 = vmatpush.bf16.msra.mxu3 %v445_v50 }
  0x2b   :  { %189 = vmatpush.bf16.msra.mxu0 %v349_v37 }
  0x2c   :  { %202 = vmatpush.bf16.msra.mxu1 %v353_v38 }
  0x2e   :  { %284 = vmatpush.bf16.msra.mxu2 %v444_v54  ;;  %302 = vmatpush.bf16.msra.mxu3 %v444_v54 }
  0x2f   :  { %190 = vmatpush.bf16.msra.mxu0 %v341_v44 }
  0x30   :  { %203 = vmatpush.bf16.msra.mxu1 %v345_v45 }
  0x32   :  { %285 = vmatpush.bf16.msra.mxu2 %v443_v56  ;;  %303 = vmatpush.bf16.msra.mxu3 %v443_v56 }
  0x33   :  { %191 = vmatpush.bf16.msra.mxu0 %v333_v51 }
  0x34   :  { %204 = vmatpush.bf16.msra.mxu1 %v337_v53 }
  0x36   :  { %192 = vmatmul.bf16.vlgmr.msra.gmra.mxu0 %v97_v55  ;;  %286 = vmatpush.bf16.msra.mxu2 %v442_v57 }
  0x37   :  { %205 = vmatmul.bf16.vlgmr.msra.gmra.mxu1 %v97_v55  ;;  %304 = vmatpush.bf16.msra.mxu3 %v442_v57 }
  0xb3   :  { %v193_v61 = vpop.f32.mrf.mxu0 }
  0xb4   :  { %v194_v62 = vadd.f32 %v193_v61, %v100_v59  ;;  %v206_v63 = vpop.f32.mrf.mxu1 }
  0xb5   :  { %v207_v0 = vadd.f32 %v206_v63, %v101_v60 }
  0xb7   :  { %v210_v1 = vpack.c.bf16 %v207_v0, %v194_v62 }
  0xb9   :  { %287 = vmatmul.bf16.vlgmr.msra.gmra.mxu2 %v210_v1  ;;  %v294_v2 = vunpack.c.h.b16 %v210_v1 }
  0xbb   :  { %v195_v3 = vpop.f32.mrf.mxu0  ;;  %v295_v4 = vpack.c.b16 %v294_v2, %v294_v2 }
  0xbc   :  { %v208_v5 = vpop.f32.mrf.mxu1 }
  0xbd   :  { %305 = vmatmul.bf16.vlgmr.msra.gmra.mxu3 %v295_v4 }
 0x13c   :  { %v288_v7 = vpop.f32.mrf.mxu2 }
 0x13d   :  { %v289_v8 = vadd.f32 %v459_v6, %v288_v7 }
 0x13f   :  { %292 = vst [vmem:[#allocation10] sm:$0x3] %v289_v8 }
 0x140   :  { %v306_v9 = vpop.f32.mrf.mxu3 }
 0x141   :  { %v307_v10 = vadd.f32 %v459_v6, %v306_v9 }
 0x143   :  { %310 = vst [vmem:[#allocation10 + $0x2] sm:$0x3] %v307_v10 }
 0x144   :  { %v290_v11 = vpop.f32.mrf.mxu2  ;;  %321 = dma.vmem_to_hbm [thread:$0]  %s317_s16, 64, %s319_s19, [#allocation4]  }
 0x148   :  { %v308_v12 = vpop.f32.mrf.mxu3 }
 0x149   :  { %586 = dma.done.wait [#allocation4], 64  }
 0x14a   :  { %587 = vsyncadd [#allocation4], 4294967232 }
 0x14b   :  { %326 = vsyncpa [#allocation3], 1 }
 0x14c   :  { %327 = vsyncpa [#allocation6], 1 }
 0x14d   :  { %328 = vsyncpa [#allocation9], 1 }
 0x14e   :  { %329 = vsyncpa [#allocation4], 1 }

</bundles_post_ra>
